<compile_context>
chip_gen: v7x
topology: tpu7x:2x2x1
jax: 0.10.0
libtpu: 0.0.40
codegen_flags: <defaults>
</compile_context>

<pallas_src>
import jax
import jax.numpy as jnp
from jax.experimental import pallas as pl
from jax.experimental.pallas import tpu as pltpu


def _pgen_kernel(ctx_ref, dec_op_ref, dec_inp_ref, w_ref, b_ref, out_ref):
    c = ctx_ref.shape[1]
    o = dec_op_ref.shape[1]
    # logits = cat(ctx, dec_op, dec_inp) @ W^T + b
    #        = sum(ctx * W[:, :c]) + sum(dec_op * W[:, c:c+o])
    #        + sum(dec_inp * W[:, c+o:]) + b
    # VPU multiply + XLU lane-reduce; the weight row [1, K] broadcasts over the
    # batch sublanes.  No MXU for an N=1 "matmul".
    acc = jnp.sum(ctx_ref[...] * w_ref[:, :c], axis=-1, keepdims=True)
    acc = acc + jnp.sum(dec_op_ref[...] * w_ref[:, c:c + o], axis=-1,
                        keepdims=True)
    acc = acc + jnp.sum(dec_inp_ref[...] * w_ref[:, c + o:], axis=-1,
                        keepdims=True)
    out_ref[...] = jax.nn.sigmoid(acc + b_ref[0])


def _round_up(x, m):
    return ((x + m - 1) // m) * m


def generate_prob_pallas(context, dec_op, dec_inp, weight, bias, *, block_b=512):
    """sigmoid(cat(context, dec_op, dec_inp, 1) @ weight.T + bias) -> [B, 1]."""
    B, c = context.shape
    o = dec_op.shape[1]
    e = dec_inp.shape[1]
    K = c + o + e
    assert weight.shape == (1, K), weight.shape
    assert bias.shape == (1,), bias.shape

    # Batch tile: multiple of 8 sublanes, no bigger than the (rounded-up) batch.
    tb = min(block_b, _round_up(B, 8))
    grid = (pl.cdiv(B, tb),)

    # NOTE: the (tb, 1) output block uses masked 1-lane stores; for very large B
    # the next lever is packing the batch onto lanes ((1, tb) output block,
    # reshaped in the wrapper).  At this head's O(KiB) output it is not worth
    # the in-kernel (tb,1)->(1,tb) relayout, so the [B, 1] layout is kept.
    kernel = pl.pallas_call(
        _pgen_kernel,
        out_shape=jax.ShapeDtypeStruct((B, 1), jnp.float32),
        grid=grid,
        in_specs=[
            pl.BlockSpec((tb, c), lambda i: (i, 0)),
            pl.BlockSpec((tb, o), lambda i: (i, 0)),
            pl.BlockSpec((tb, e), lambda i: (i, 0)),
            # Weight row stays resident in VMEM across the whole grid.
            pl.BlockSpec((1, K), lambda i: (0, 0)),
            # Scalar bias in SMEM: no padded VMEM tile, no per-step DMA.
            pl.BlockSpec(memory_space=pltpu.MemorySpace.SMEM),
        ],
        out_specs=pl.BlockSpec((tb, 1), lambda i: (i, 0)),
        compiler_params=pltpu.CompilerParams(
            dimension_semantics=("parallel",),
        ),
    )
    return kernel(
        context.astype(jnp.float32),
        dec_op.astype(jnp.float32),
        dec_inp.astype(jnp.float32),
        weight.astype(jnp.float32),
        bias.astype(jnp.float32),
    )


if __name__ == "__main__":
    # Small shapes consistent with the module's forward.
    B = 8
    d_model = 16
    emb_size = 32
    trunc_norm_init_std = 0.0001

    key = jax.random.PRNGKey(0)
    k_ctx, k_op, k_inp, k_w, k_b = jax.random.split(key, 5)

    context = jax.random.normal(k_ctx, (B, 2 * d_model), dtype=jnp.float32)
    dec_op = jax.random.normal(k_op, (B, 2 * d_model), dtype=jnp.float32)
    dec_inp = jax.random.normal(k_inp, (B, emb_size), dtype=jnp.float32)

    in_features = 4 * d_model + emb_size
    # nn.Linear(4*d_model + emb_size, 1) init: weight/bias ~ N(0, 1e-4).
    weight = (jax.random.normal(k_w, (1, in_features), dtype=jnp.float32)
              * trunc_norm_init_std)
    bias = (jax.random.normal(k_b, (1,), dtype=jnp.float32)
            * trunc_norm_init_std)

    out = generate_prob_pallas(context, dec_op, dec_inp, weight, bias)
    out = jax.block_until_ready(out)

    # Plain-JAX reference of the PyTorch forward.
    temp = jnp.concatenate([context, dec_op, dec_inp], axis=1)
    ref = jax.nn.sigmoid(temp @ weight.T + bias)
    assert out.shape == (B, 1)
    assert jnp.allclose(out, ref, atol=1e-6, rtol=1e-5)

    print("KERNEL_OK")
</pallas_src>

<mosaic_0001>
module attributes {stable_mosaic.version = 11 : i64} {
  func.func @_pgen_kernel(%arg0: i32, %arg1: memref<8x32xf32, #tpu.memory_space<vmem>>, %arg2: memref<8x32xf32, #tpu.memory_space<vmem>>, %arg3: memref<8x32xf32, #tpu.memory_space<vmem>>, %arg4: memref<1x96xf32, #tpu.memory_space<vmem>>, %arg5: memref<1xf32, #tpu.memory_space<smem>>, %arg6: memref<8x1xf32, #tpu.memory_space<vmem>>) attributes {dimension_semantics = [#tpu.dimension_semantics<parallel>], iteration_bounds = array<i64: 1>, scalar_prefetch = 0 : i64, scratch_operands = 0 : i64, tpu.core_type = #tpu.core_type<tc>, window_params = [{transform_indices = @transform_0, window_bounds = array<i64: 8, 32>}, {transform_indices = @transform_1, window_bounds = array<i64: 8, 32>}, {transform_indices = @transform_2, window_bounds = array<i64: 8, 32>}, {pipeline_mode = #tpu.pipeline_mode<synchronous>, transform_indices = @transform_3, window_bounds = array<i64: 1, 96>}, {transform_indices = @transform_4, window_bounds = array<i64: 1>}, {transform_indices = @transform_5, window_bounds = array<i64: 8, 1>}]} {
    %c0 = arith.constant 0 : index
    %c0_0 = arith.constant 0 : index
    %0 = vector.load %arg1[%c0, %c0_0] : memref<8x32xf32, #tpu.memory_space<vmem>>, vector<8x32xf32>
    %c0_1 = arith.constant 0 : index
    %c0_2 = arith.constant 0 : index
    %1 = vector.load %arg4[%c0_1, %c0_2] : memref<1x96xf32, #tpu.memory_space<vmem>>, vector<1x32xf32>
    %2 = vector.broadcast %1 : vector<1x32xf32> to vector<8x32xf32>
    %3 = arith.mulf %0, %2 : vector<8x32xf32>
    %cst = arith.constant dense<0.000000e+00> : vector<8xf32>
    %4 = vector.multi_reduction <add>, %3, %cst [1] : vector<8x32xf32> to vector<8xf32>
    %5 = vector.shape_cast %4 : vector<8xf32> to vector<8x1xf32>
    %c0_3 = arith.constant 0 : index
    %c0_4 = arith.constant 0 : index
    %6 = vector.load %arg2[%c0_3, %c0_4] : memref<8x32xf32, #tpu.memory_space<vmem>>, vector<8x32xf32>
    %c0_5 = arith.constant 0 : index
    %c32 = arith.constant 32 : index
    %7 = vector.load %arg4[%c0_5, %c32] : memref<1x96xf32, #tpu.memory_space<vmem>>, vector<1x32xf32>
    %8 = vector.broadcast %7 : vector<1x32xf32> to vector<8x32xf32>
    %9 = arith.mulf %6, %8 : vector<8x32xf32>
    %cst_6 = arith.constant dense<0.000000e+00> : vector<8xf32>
    %10 = vector.multi_reduction <add>, %9, %cst_6 [1] : vector<8x32xf32> to vector<8xf32>
    %11 = vector.shape_cast %10 : vector<8xf32> to vector<8x1xf32>
    %12 = arith.addf %5, %11 : vector<8x1xf32>
    %c0_7 = arith.constant 0 : index
    %c0_8 = arith.constant 0 : index
    %13 = vector.load %arg3[%c0_7, %c0_8] : memref<8x32xf32, #tpu.memory_space<vmem>>, vector<8x32xf32>
    %c0_9 = arith.constant 0 : index
    %c64 = arith.constant 64 : index
    %14 = vector.load %arg4[%c0_9, %c64] : memref<1x96xf32, #tpu.memory_space<vmem>>, vector<1x32xf32>
    %15 = vector.broadcast %14 : vector<1x32xf32> to vector<8x32xf32>
    %16 = arith.mulf %13, %15 : vector<8x32xf32>
    %cst_10 = arith.constant dense<0.000000e+00> : vector<8xf32>
    %17 = vector.multi_reduction <add>, %16, %cst_10 [1] : vector<8x32xf32> to vector<8xf32>
    %18 = vector.shape_cast %17 : vector<8xf32> to vector<8x1xf32>
    %19 = arith.addf %12, %18 : vector<8x1xf32>
    %c0_11 = arith.constant 0 : index
    %20 = memref.load %arg5[%c0_11] : memref<1xf32, #tpu.memory_space<smem>>
    %21 = vector.broadcast %20 : f32 to vector<8x1xf32>
    %22 = arith.addf %19, %21 : vector<8x1xf32>
    %23 = arith.negf %22 : vector<8x1xf32>
    %24 = math.exp %23 : vector<8x1xf32>
    %cst_12 = arith.constant 1.000000e+00 : f32
    %25 = vector.broadcast %cst_12 : f32 to vector<8x1xf32>
    %26 = arith.addf %25, %24 : vector<8x1xf32>
    %27 = arith.divf %25, %26 : vector<8x1xf32>
    %c0_13 = arith.constant 0 : index
    %c0_14 = arith.constant 0 : index
    %28 = vector.load %arg6[%c0_13, %c0_14] : memref<8x1xf32, #tpu.memory_space<vmem>>, vector<8x1xf32>
    tpu.vector_store %arg6[%c0_13, %c0_14], %27 {strides = array<i32>} : memref<8x1xf32, #tpu.memory_space<vmem>>, vector<8x1xf32>,
    return
  }
  func.func @transform_0(%arg0: i32) -> (i32, i32) {
    %c0_i32 = arith.constant 0 : i32
    %c0_i32_0 = arith.constant 0 : i32
    return %arg0, %c0_i32 : i32, i32
  }
  func.func @transform_1(%arg0: i32) -> (i32, i32) {
    %c0_i32 = arith.constant 0 : i32
    %c0_i32_0 = arith.constant 0 : i32
    return %arg0, %c0_i32 : i32, i32
  }
  func.func @transform_2(%arg0: i32) -> (i32, i32) {
    %c0_i32 = arith.constant 0 : i32
    %c0_i32_0 = arith.constant 0 : i32
    return %arg0, %c0_i32 : i32, i32
  }
  func.func @transform_3(%arg0: i32) -> (i32, i32) {
    %c0_i32 = arith.constant 0 : i32
    %c0_i32_0 = arith.constant 0 : i32
    %c0_i32_1 = arith.constant 0 : i32
    return %c0_i32, %c0_i32_0 : i32, i32
  }
  func.func @transform_4(%arg0: i32) -> i32 {
    %c0_i32 = arith.constant 0 : i32
    %c0_i32_0 = arith.constant 0 : i32
    return %c0_i32 : i32
  }
  func.func @transform_5(%arg0: i32) -> (i32, i32) {
    %c0_i32 = arith.constant 0 : i32
    %c0_i32_0 = arith.constant 0 : i32
    return %arg0, %c0_i32 : i32, i32
  }
}

</mosaic_0001>

<bundles_post_ra>
// kernel: tpu_custom_call.1
= control target key start
LH: loop header
LB: loop body
LE: loop exit
PB: predicated region body
PF: predicated region fallthrough
CT: control target
= control target key end

     0   :  { %11 = vsyncpa [#allocation4], 0  ;;  %s224_s0 = inlined_call_operand.hbm [shape: f32[8,32], index: 0, kind: input, shape index: {}]   ;;  %s225_s1 = inlined_call_operand.hbm [shape: f32[8,32], index: 1, kind: input, shape index: {}]   ;;  %s226_s2 = inlined_call_operand.vmem [shape: f32[8,32], index: 2, kind: input, shape index: {}]   ;;  %s227_s3 = inlined_call_operand.vmem [shape: f32[1,96], index: 3, kind: input, shape index: {}]   ;;  %s228_s4 = inlined_call_operand.<no memory space> [shape: f32[1], index: 4, kind: input, shape index: {}]   ;;  %s229_s5 = inlined_call_operand.vmem [shape: f32[8,1], index: 5, kind: output, shape index: {}]  }
   0x1   :  { %12 = vsyncpa [#allocation6], 0  ;;  %s151_s18 = smov [#allocation3]   ;;  %s152_s20 = smov [#allocation5]  }
   0x2   :  { %s19_s19 = sshll.u32 %s151_s18, 4  ;;  %s29_s21 = sshll.u32 %s152_s20, 4  ;;  %s20_s19 = int_to_ptr.vmem [resolvable:$true] %s19_s19  ;;  %s30_s21 = int_to_ptr.vmem [resolvable:$true] %s29_s21 }
   0x3   :  { %s103_s24 = scalar_lea.hbm %s224_s0, 128 }
   0x4   :  { %p104_p0 = scmp.ne.s32.totalorder %s224_s0, %s103_s24  ;;  %p107_p1 = scmp.lt.u32.totalorder %s103_s24, %s224_s0 }
   0x6   :  { %p109_p2 = pnand %p107_p1, %p104_p0 }
   0x8   :  { %112 = shalt.err (!%p109_p2)
}
   0x9   :  { %s113_s29 = scalar_lea.vmem %s20_s19, 128  ;;  %p118_p4 = scmp.lt.s32.totalorder %s20_s19, %s20_s19 }
   0xa   :  { %p114_p3 = scmp.ne.s32.totalorder %s20_s19, %s113_s29  ;;  %p119_p5 = scmp.lt.s32.totalorder %s113_s29, %s113_s29 }
   0xc   :  { %p120_p6 = por %p119_p5, %p118_p4 }
   0xe   :  { %p121_p7 = pnand %p120_p6, %p114_p3 }
  0x10   :  { %124 = shalt.err (!%p121_p7)
}
  0x11   :  { %22 = dma.hbm_to_vmem [thread:$0]  %s224_s0, 128, %s20_s19, [#allocation4]  }
  0x12   :  { %s125_s9 = scalar_lea.hbm %s225_s1, 128 }
  0x13   :  { %p126_p8 = scmp.ne.s32.totalorder %s225_s1, %s125_s9  ;;  %p129_p9 = scmp.lt.u32.totalorder %s125_s9, %s225_s1 }
  0x15   :  { %p131_p10 = pnand %p129_p9, %p126_p8 }
  0x17   :  { %134 = shalt.err (!%p131_p10)
}
  0x18   :  { %s135_s14 = scalar_lea.vmem %s30_s21, 128  ;;  %p140_p12 = scmp.lt.s32.totalorder %s30_s21, %s30_s21 }
  0x19   :  { %p136_p11 = scmp.ne.s32.totalorder %s30_s21, %s135_s14  ;;  %p141_p13 = scmp.lt.s32.totalorder %s135_s14, %s135_s14 }
  0x1b   :  { %p142_p0 = por %p141_p13, %p140_p12 }
  0x1d   :  { %p143_p1 = pnand %p142_p0, %p136_p11 }
  0x1f   :  { %146 = shalt.err (!%p143_p1)
}
  0x20   :  { %32 = dma.hbm_to_vmem [thread:$0]  %s225_s1, 128, %s30_s21, [#allocation6]  }
  0x21   :  { %147 = dma.done.wait [#allocation4], 128  }
  0x22   :  { %148 = vsyncadd [#allocation4], 4294967168 }
  0x23   :  { %149 = dma.done.wait [#allocation6], 128  }
  0x24   :  { %150 = vsyncadd [#allocation6], 4294967168  ;;  %v93_v0 = vld [vmem:[%s227_s3] ss:$0 sm:$0xff]  ;;  %vm54_vm0 = vcmask 261120   ;;  %s153_s18 = smov 96   ;;  %v77_v15 = vstv %s228_s4 }
  0x25   :  { %v45_v1 = vld [vmem:[#allocation3] sm:$0xff]  ;;  %59 = vrot.lane.b32.xlu0 %v93_v0, %s153_s18  ;;  %s154_s19 = smov 64   ;;  %v58_v4 = vld [vmem:[#allocation5] sm:$0xff]  ;;  %vm85_vm1 = vcmask 7168  }
  0x26   :  { %v53_v2 = vmul.f32 %v93_v0, %v45_v1  ;;  %v67_v7 = vld [vmem:[%s226_s2] sm:$0xff] }
  0x28   :  { %v55_v3 = vsel %vm54_vm0, %v53_v2, 0.0 }
  0x29   :  { %56 = vadd.xlane.f32.xlu1 %v55_v3  ;;  %68 = vrot.lane.b32.xlu0 %v93_v0, %s154_s19 }
  0x97   :  { %v60_v5 = vpop.permute.xlu0 %59 }
  0x98   :  { %v62_v6 = vmul.f32 %v60_v5, %v58_v4 }
  0x9a   :  { %v63_v8 = vsel %vm54_vm0, %v62_v6, 0.0 }
  0x9b   :  { %v69_v9 = vpop.permute.xlu0 %68  ;;  %64 = vadd.xlane.f32.xlu1 %v63_v8 }
  0x9c   :  { %v71_v10 = vmul.f32 %v69_v9, %v67_v7 }
  0x9e   :  { %v72_v11 = vsel %vm54_vm0, %v71_v10, 0.0 }
  0x9f   :  { %73 = vadd.xlane.f32.xlu0 %v72_v11 }
  0xb6   :  { %v57_v12 = vpop.xlane.xlu1 %56 }
 0x128   :  { %v65_v13 = vpop.xlane.xlu1 %64 }
 0x129   :  { %v66_v14 = vadd.f32 %v65_v13, %v57_v12 }
 0x12c   :  { %v74_v16 = vpop.xlane.xlu0 %73 }
 0x12d   :  { %v75_v17 = vadd.f32 %v74_v16, %v66_v14 }
 0x12f   :  { %v78_v18 = vadd.f32 %v77_v15, %v75_v17 }
 0x131   :  { %v94_v19 = vmul.f32 -1.442695, %v78_v18 }
 0x133   :  { %99 = vpow2.f32 %v94_v19 }
 0x13d   :  { %v100_v20 = vpop.eup %99 }
 0x13e   :  { %v82_v21 = vadd.f32 1.0, %v100_v20 }
 0x140   :  { %101 = vrcp.f32 %v82_v21 }
 0x14a   :  { %v102_v22 = vpop.eup %101 }
 0x14b   :  { %86 = vst.msk [vmem:[%s229_s5] sm:$0xff] %vm85_vm1, %v102_v22 }
 0x14c   :  { %91 = vsyncpa [#allocation4], 1 }
 0x14d   :  { %92 = vsyncpa [#allocation6], 1 }

</bundles_post_ra>
